<compile_context>
chip_gen: v5e
topology: v5e:2x2
jax: 0.10.0
libtpu: 0.0.40
codegen_flags: <defaults>
</compile_context>

<pallas_src>
import functools

import jax
import jax.numpy as jnp
from jax.experimental import pallas as pl
from jax.experimental.pallas import tpu as pltpu

_VMEM_LIMIT = 32 * 1024 * 1024  # safe on v5e (16 MiB default scoped) .. v7x (64 MiB physical)


def _round_up(x, m):
    return (x + m - 1) // m * m


# -----------------------------------------------------------------------------------
# channels_last: normalize over the trailing C axis.  x is viewed as (M, C); rows are
# tiled along a "parallel" grid axis (pipelining on all chips, megacore on v7x).
# -----------------------------------------------------------------------------------
def _ln_channels_last_kernel(x_ref, w_ref, b_ref, o_ref, *, eps):
    x = x_ref[...]                                           # (bm, C)
    u = jnp.mean(x, axis=-1, keepdims=True)
    d = x - u
    s = jnp.mean(d * d, axis=-1, keepdims=True)
    o_ref[...] = d * jax.lax.rsqrt(s + eps) * w_ref[...] + b_ref[...]


def layernorm_channels_last(x, weight, bias, eps=1e-6, block_rows=256):
    orig_shape = x.shape
    C = orig_shape[-1]
    x2d = x.reshape(-1, C)
    M = x2d.shape[0]

    bm = min(block_rows, _round_up(M, 8))        # multiple of 8 sublanes
    Mp = _round_up(M, bm)
    if Mp != M:
        # per-row normalization: padded rows only affect themselves and are sliced off
        x2d = jnp.pad(x2d, ((0, Mp - M), (0, 0)))

    y = pl.pallas_call(
        functools.partial(_ln_channels_last_kernel, eps=eps),
        out_shape=jax.ShapeDtypeStruct((Mp, C), x.dtype),
        grid=(Mp // bm,),
        in_specs=[
            pl.BlockSpec((bm, C), lambda i: (i, 0)),
            pl.BlockSpec((1, C), lambda i: (0, 0)),
            pl.BlockSpec((1, C), lambda i: (0, 0)),
        ],
        out_specs=pl.BlockSpec((bm, C), lambda i: (i, 0)),
        compiler_params=pltpu.CompilerParams(
            dimension_semantics=("parallel",),
            vmem_limit_bytes=_VMEM_LIMIT,
        ),
    )(x2d, weight.reshape(1, C), bias.reshape(1, C))
    return y[:M].reshape(orig_shape)


# -----------------------------------------------------------------------------------
# channels_first: x is (N, C, H, W); normalize over C for every (n, h, w).
# We keep the native layout (no transposes): view as (N, C, H*W) so H*W maps onto the
# lane axis (lane-dense even for tiny C) and the reduction over C uses the XLU.
# -----------------------------------------------------------------------------------
def _ln_channels_first_kernel(x_ref, w_ref, b_ref, o_ref, *, eps):
    x = x_ref[...]                                           # (1, C, T)
    u = jnp.mean(x, axis=1, keepdims=True)                   # (1, 1, T)
    d = x - u
    s = jnp.mean(d * d, axis=1, keepdims=True)
    o_ref[...] = d * jax.lax.rsqrt(s + eps) * w_ref[...] + b_ref[...]


def layernorm_channels_first(x, weight, bias, eps=1e-6, block_cols=512):
    N, C, H, W = x.shape
    HW = H * W
    x3 = x.reshape(N, C, HW)

    bl = min(block_cols, _round_up(HW, 128))     # multiple of 128 lanes
    HWp = _round_up(HW, bl)
    if HWp != HW:
        # each lane is an independent normalization group -> padding is harmless
        x3 = jnp.pad(x3, ((0, 0), (0, 0), (0, HWp - HW)))

    y = pl.pallas_call(
        functools.partial(_ln_channels_first_kernel, eps=eps),
        out_shape=jax.ShapeDtypeStruct((N, C, HWp), x.dtype),
        grid=(N, HWp // bl),
        in_specs=[
            pl.BlockSpec((1, C, bl), lambda n, j: (n, 0, j)),
            pl.BlockSpec((1, C, 1), lambda n, j: (0, 0, 0)),
            pl.BlockSpec((1, C, 1), lambda n, j: (0, 0, 0)),
        ],
        out_specs=pl.BlockSpec((1, C, bl), lambda n, j: (n, 0, j)),
        compiler_params=pltpu.CompilerParams(
            dimension_semantics=("parallel", "parallel"),
            vmem_limit_bytes=_VMEM_LIMIT,
        ),
    )(x3, weight.reshape(1, C, 1), bias.reshape(1, C, 1))
    return y[:, :, :HW].reshape(N, C, H, W)


# -----------------------------------------------------------------------------------
# Module-equivalent entry point.
# -----------------------------------------------------------------------------------
def layer_norm(x, weight, bias, eps=1e-6, data_format="channels_last"):
    if data_format == "channels_last":
        return layernorm_channels_last(x, weight, bias, eps)
    elif data_format == "channels_first":
        return layernorm_channels_first(x, weight, bias, eps)
    else:
        raise NotImplementedError(data_format)


# --------------------------------------- main ---------------------------------------
if __name__ == "__main__":
    key = jax.random.PRNGKey(0)
    k1, k2, k3, k4 = jax.random.split(key, 4)

    N, C, H, W = 2, 4, 16, 16
    eps = 1e-6

    weight = 1.0 + 0.1 * jax.random.normal(k3, (C,), jnp.float32)
    bias = 0.1 * jax.random.normal(k4, (C,), jnp.float32)

    x_cf = jax.random.normal(k1, (N, C, H, W), jnp.float32)   # channels_first (NCHW)
    x_cl = jax.random.normal(k2, (N, H, W, C), jnp.float32)   # channels_last  (NHWC)

    ln_cf = jax.jit(functools.partial(layer_norm, eps=eps, data_format="channels_first"))
    ln_cl = jax.jit(functools.partial(layer_norm, eps=eps, data_format="channels_last"))

    y_cf = jax.block_until_ready(ln_cf(x_cf, weight, bias))
    y_cl = jax.block_until_ready(ln_cl(x_cl, weight, bias))

    # pure-JAX references matching the torch module math
    def ref_cl(x):
        u = x.mean(-1, keepdims=True)
        s = ((x - u) ** 2).mean(-1, keepdims=True)
        return (x - u) / jnp.sqrt(s + eps) * weight + bias

    def ref_cf(x):
        u = x.mean(1, keepdims=True)
        s = ((x - u) ** 2).mean(1, keepdims=True)
        xh = (x - u) / jnp.sqrt(s + eps)
        return weight[None, :, None, None] * xh + bias[None, :, None, None]

    assert y_cf.shape == (N, C, H, W)
    assert y_cl.shape == (N, H, W, C)
    assert bool(jnp.all(jnp.isfinite(y_cf))) and bool(jnp.all(jnp.isfinite(y_cl)))
    assert jnp.allclose(y_cf, ref_cf(x_cf), atol=1e-5, rtol=1e-5)
    assert jnp.allclose(y_cl, ref_cl(x_cl), atol=1e-5, rtol=1e-5)

    print("KERNEL_OK")
</pallas_src>

<mosaic_0001>
module attributes {stable_mosaic.version = 11 : i64} {
  func.func @_ln_channels_first_kernel(%arg0: i32, %arg1: i32, %arg2: memref<1x4x256xf32, #tpu.memory_space<vmem>>, %arg3: memref<1x4x1xf32, #tpu.memory_space<vmem>>, %arg4: memref<1x4x1xf32, #tpu.memory_space<vmem>>, %arg5: memref<1x4x256xf32, #tpu.memory_space<vmem>>) attributes {dimension_semantics = [#tpu.dimension_semantics<parallel>, #tpu.dimension_semantics<parallel>], iteration_bounds = array<i64: 2, 1>, scalar_prefetch = 0 : i64, scratch_operands = 0 : i64, tpu.core_type = #tpu.core_type<tc>, window_params = [{transform_indices = @transform_0, window_bounds = array<i64: 1, 4, 256>}, {pipeline_mode = #tpu.pipeline_mode<synchronous>, transform_indices = @transform_1, window_bounds = array<i64: 1, 4, 1>}, {pipeline_mode = #tpu.pipeline_mode<synchronous>, transform_indices = @transform_2, window_bounds = array<i64: 1, 4, 1>}, {transform_indices = @transform_3, window_bounds = array<i64: 1, 4, 256>}]} {
    %c0 = arith.constant 0 : index
    %c0_0 = arith.constant 0 : index
    %c0_1 = arith.constant 0 : index
    %0 = vector.load %arg2[%c0, %c0_0, %c0_1] : memref<1x4x256xf32, #tpu.memory_space<vmem>>, vector<1x4x256xf32>
    %cst = arith.constant dense<0.000000e+00> : vector<1x256xf32>
    %1 = vector.multi_reduction <add>, %0, %cst [1] : vector<1x4x256xf32> to vector<1x256xf32>
    %2 = vector.shape_cast %1 : vector<1x256xf32> to vector<1x1x256xf32>
    %cst_2 = arith.constant 4.000000e+00 : f32
    %3 = vector.broadcast %cst_2 : f32 to vector<1x1x256xf32>
    %4 = arith.divf %2, %3 : vector<1x1x256xf32>
    %5 = vector.broadcast %4 : vector<1x1x256xf32> to vector<1x4x256xf32>
    %6 = arith.subf %0, %5 : vector<1x4x256xf32>
    %7 = arith.mulf %6, %6 : vector<1x4x256xf32>
    %cst_3 = arith.constant dense<0.000000e+00> : vector<1x256xf32>
    %8 = vector.multi_reduction <add>, %7, %cst_3 [1] : vector<1x4x256xf32> to vector<1x256xf32>
    %9 = vector.shape_cast %8 : vector<1x256xf32> to vector<1x1x256xf32>
    %cst_4 = arith.constant 4.000000e+00 : f32
    %10 = vector.broadcast %cst_4 : f32 to vector<1x1x256xf32>
    %11 = arith.divf %9, %10 : vector<1x1x256xf32>
    %cst_5 = arith.constant 9.99999997E-7 : f32
    %12 = vector.broadcast %cst_5 : f32 to vector<1x1x256xf32>
    %13 = arith.addf %11, %12 : vector<1x1x256xf32>
    %14 = math.rsqrt %13 : vector<1x1x256xf32>
    %15 = vector.broadcast %14 : vector<1x1x256xf32> to vector<1x4x256xf32>
    %16 = arith.mulf %6, %15 : vector<1x4x256xf32>
    %c0_6 = arith.constant 0 : index
    %c0_7 = arith.constant 0 : index
    %c0_8 = arith.constant 0 : index
    %17 = vector.load %arg3[%c0_6, %c0_7, %c0_8] : memref<1x4x1xf32, #tpu.memory_space<vmem>>, vector<1x4x1xf32>
    %18 = vector.broadcast %17 : vector<1x4x1xf32> to vector<1x4x256xf32>
    %19 = arith.mulf %16, %18 : vector<1x4x256xf32>
    %c0_9 = arith.constant 0 : index
    %c0_10 = arith.constant 0 : index
    %c0_11 = arith.constant 0 : index
    %20 = vector.load %arg4[%c0_9, %c0_10, %c0_11] : memref<1x4x1xf32, #tpu.memory_space<vmem>>, vector<1x4x1xf32>
    %21 = vector.broadcast %20 : vector<1x4x1xf32> to vector<1x4x256xf32>
    %22 = arith.addf %19, %21 : vector<1x4x256xf32>
    %c0_12 = arith.constant 0 : index
    %c0_13 = arith.constant 0 : index
    %c0_14 = arith.constant 0 : index
    %23 = vector.load %arg5[%c0_12, %c0_13, %c0_14] : memref<1x4x256xf32, #tpu.memory_space<vmem>>, vector<1x4x256xf32>
    tpu.vector_store %arg5[%c0_12, %c0_13, %c0_14], %22 {strides = array<i32>} : memref<1x4x256xf32, #tpu.memory_space<vmem>>, vector<1x4x256xf32>,
    return
  }
  func.func @transform_0(%arg0: i32, %arg1: i32) -> (i32, i32, i32) {
    %c0_i32 = arith.constant 0 : i32
    %c0_i32_0 = arith.constant 0 : i32
    return %arg0, %c0_i32, %arg1 : i32, i32, i32
  }
  func.func @transform_1(%arg0: i32, %arg1: i32) -> (i32, i32, i32) {
    %c0_i32 = arith.constant 0 : i32
    %c0_i32_0 = arith.constant 0 : i32
    %c0_i32_1 = arith.constant 0 : i32
    %c0_i32_2 = arith.constant 0 : i32
    return %c0_i32, %c0_i32_0, %c0_i32_1 : i32, i32, i32
  }
  func.func @transform_2(%arg0: i32, %arg1: i32) -> (i32, i32, i32) {
    %c0_i32 = arith.constant 0 : i32
    %c0_i32_0 = arith.constant 0 : i32
    %c0_i32_1 = arith.constant 0 : i32
    %c0_i32_2 = arith.constant 0 : i32
    return %c0_i32, %c0_i32_0, %c0_i32_1 : i32, i32, i32
  }
  func.func @transform_3(%arg0: i32, %arg1: i32) -> (i32, i32, i32) {
    %c0_i32 = arith.constant 0 : i32
    %c0_i32_0 = arith.constant 0 : i32
    return %arg0, %c0_i32, %arg1 : i32, i32, i32
  }
}

</mosaic_0001>

<bundles_post_ra>
// kernel: layer_norm.1
= control target key start
LH: loop header
LB: loop body
LE: loop exit
PB: predicated region body
PF: predicated region fallthrough
CT: control target
= control target key end

     0   :  { %s502_s12 = smov 0   ;;  %s504_s13 = smov 0   ;;  %s554_s0 = inlined_call_operand.vmem [shape: f32[2,4,256], index: 0, kind: input, shape index: {}]   ;;  %s555_s1 = inlined_call_operand.vmem [shape: f32[1,4,1], index: 1, kind: input, shape index: {}]   ;;  %s556_s2 = inlined_call_operand.vmem [shape: f32[1,4,1], index: 2, kind: input, shape index: {}]   ;;  %s557_s3 = inlined_call_operand.vmem [shape: f32[2,4,256], index: 3, kind: output, shape index: {}]  }
   0x1   :  { %s506_s14 = smov 0  }
   0x2 LB: > { %s25_s15 = sadd.s32 1, %s473_s13  ;;  %p412_p0 = scmp.ge.s32.totalorder %s477_s14, 1  ;;  %s477_s14 = sphi %s506_s14, %s13_s14   ;;  %s473_s13 = sphi %s504_s13, %s559_s13   ;;  %s469_s12 = sphi %s502_s12, %s558_s12  }
   0x3   : > { %p27_p1 = scmp.ge.s32.totalorder %s25_s15, 2  ;;  %p158_p2 = scmp.lt.s32.totalorder %s477_s14, 3 }
   0x5   : > { %s561_s15 = smov (%p27_p1, %s25_s15), 0  ;;  %p159_p3 = pnand %p412_p0, %p158_p2 }
   0x6   : > { %p191_p4 = scmp.lt.s32.totalorder (!%p159_p3), %s469_s12, 1 }
   0x7   : > { %162 = sbr.rel (%p159_p3) target bundleno = 142 (0x8e), region = 32 }
   0xc   : > { %v298_v0 = vld [vmem:[%s555_s1] sm:$0xf]  ;;  %v479_v1 = vmov 0   ;;  %s563_s12 = smov (!%p191_p4, %s469_s12), 1  ;;  %v480_v4 = vmov 4.0   ;;  %vm217_vm0 = vcmask 1043456  }
   0xd   : > { %448 = vset.pattern.permute.xlu0 %v479_v1  ;;  %s419_s18 = sshll.u32 %s563_s12, 3  ;;  %v309_v2 = vld [vmem:[%s556_s2] sm:$0xf]  ;;  %449 = vrcp.f32 %v480_v4 }
   0xe   : > { %301 = vperm.xlu0 %448, %v298_v0   ;;  %s198_s21 = scalar_lea.vmem %s554_s0, %s419_s18  ;;  %s208_s26 = scalar_lea.vmem %s557_s3, %s419_s18 }
   0xf   : > { %v210_v3 = vld [vmem:[%s198_s21] sm:$0xff] }
  0x10   : > { %212 = vst [vmem:[#allocation1] ss:$2 sm:$0xff] %v210_v3 }
  0x13   : > { %v450_v10 = vpop.eup %449 }
  0x14   : > { %v233_v13 = vmul.f32 4.0, %v450_v10  ;;  %vm237_vm1 = vweird.f32 %v450_v10 }
  0x16   : > { %312 = vperm.xlu0 %448, %v309_v2   ;;  %v234_v16 = vsub.f32 1.0, %v233_v13 }
  0x17   : > { %v214_v5 = vld.sshfl [vmem:[#allocation1 + $0x8] sm:$0xff pattern:$0x75316420]  ;;  %v213_v7 = vld.sshfl [vmem:[#allocation1] sm:$0xff pattern:$0x75316420] }
  0x18   : > { %v225_v6 = vsel %vm217_vm0, %v214_v5, 0.0  ;;  %v218_v9 = vsel %vm217_vm0, %v213_v7, 0.0  ;;  %v235_v19 = vmul.f32 %v450_v10, %v234_v16 }
  0x19   : > { %v226_v8 = vrot.slane %v225_v6, 4  ;;  %v219_v11 = vrot.slane %v218_v9, 4 }
  0x1a   : > { %v236_v22 = vadd.f32 %v450_v10, %v235_v19 }
  0x1b   : > { %v227_v12 = vadd.f32 %v226_v8, %v225_v6  ;;  %v220_v14 = vadd.f32 %v219_v11, %v218_v9  ;;  %v481_v6 = vmov 839922192  }
  0x1c   : > { %v238_v25 = vsel %vm237_vm1, %v450_v10, %v236_v22  ;;  %v304_v7 = vunpack.c.l.s4 %v481_v6 }
  0x1d   : > { %v228_v15 = vrot.slane %v227_v12, 2  ;;  %v221_v17 = vrot.slane %v220_v14, 2 }
  0x1e   : > { %v305_v9 = vunpack.c.0.s8 %v304_v7 }
  0x1f   : > { %v229_v18 = vadd.f32 %v228_v15, %v227_v12  ;;  %v222_v20 = vadd.f32 %v221_v17, %v220_v14 }
  0x21   : > { %v230_v21 = vrot.slane %v229_v18, 1  ;;  %v223_v23 = vrot.slane %v222_v20, 1 }
  0x23   : > { %v231_v24 = vadd.f32 %v230_v21, %v229_v18  ;;  %v224_v26 = vadd.f32 %v223_v23, %v222_v20 }
  0x25   : > { %v240_v27 = vmul.f32 %v238_v25, %v231_v24  ;;  %v239_v28 = vmul.f32 %v238_v25, %v224_v26 }
  0x27   : > { %v243_v29 = vrot.slane %v240_v27, 4 }
  0x29   : > { %v244_v30 = vsel %vm217_vm0, %v239_v28, %v243_v29 }
  0x2a   : > { %v246_v31 = vsub.f32 %v210_v3, %v244_v30 }
  0x2c   : > { %v247_v32 = vmul.f32 %v246_v31, %v246_v31 }
  0x2e   : > { %249 = vst [vmem:[#allocation1] ss:$2 sm:$0xff] %v247_v32 }
  0x35   : > { %v251_v33 = vld.sshfl [vmem:[#allocation1 + $0x8] sm:$0xff pattern:$0x75316420]  ;;  %v250_v35 = vld.sshfl [vmem:[#allocation1] sm:$0xff pattern:$0x75316420] }
  0x36   : > { %v261_v34 = vsel %vm217_vm0, %v251_v33, 0.0  ;;  %v254_v37 = vsel %vm217_vm0, %v250_v35, 0.0 }
  0x37   : > { %v262_v36 = vrot.slane %v261_v34, 4  ;;  %v255_v38 = vrot.slane %v254_v37, 4 }
  0x39   : > { %v263_v39 = vadd.f32 %v262_v36, %v261_v34  ;;  %v256_v40 = vadd.f32 %v255_v38, %v254_v37 }
  0x3b   : > { %v264_v41 = vrot.slane %v263_v39, 2  ;;  %v257_v42 = vrot.slane %v256_v40, 2 }
  0x3d   : > { %v265_v43 = vadd.f32 %v264_v41, %v263_v39  ;;  %v258_v44 = vadd.f32 %v257_v42, %v256_v40 }
  0x3f   : > { %v266_v45 = vrot.slane %v265_v43, 1  ;;  %v259_v46 = vrot.slane %v258_v44, 1 }
  0x41   : > { %v267_v47 = vadd.f32 %v266_v45, %v265_v43  ;;  %v260_v48 = vadd.f32 %v259_v46, %v258_v44 }
  0x43   : > { %v269_v49 = vmul.f32 %v267_v47, %v238_v25  ;;  %v268_v50 = vmul.f32 %v260_v48, %v238_v25 }
  0x45   : > { %v271_v51 = vadd.f32 1e-06, %v269_v49  ;;  %v270_v52 = vadd.f32 1e-06, %v268_v50 }
  0x47   : > { %451 = vrsqrt.f32 %v271_v51  ;;  %vm288_vm2 = vweird.f32 %v271_v51  ;;  %vm278_vm5 = vweird.f32 %v270_v52 }
  0x48   : > { %453 = vrsqrt.f32 %v270_v52 }
  0x4d   : > { %v452_v53 = vpop.eup %451 }
  0x4e   : > { %v283_v54 = vmul.f32 %v452_v53, %v271_v51  ;;  %v454_v55 = vpop.eup %453  ;;  %vm289_vm3 = vweird.f32 %v452_v53 }
  0x4f   : > { %v273_v56 = vmul.f32 %v454_v55, %v270_v52  ;;  %vm290_vm4 = vmor %vm288_vm2, %vm289_vm3  ;;  %vm279_vm6 = vweird.f32 %v454_v55 }
  0x50   : > { %v284_v57 = vmul.f32 %v452_v53, %v283_v54  ;;  %vm280_vm7 = vmor %vm278_vm5, %vm279_vm6 }
  0x51   : > { %v274_v58 = vmul.f32 %v454_v55, %v273_v56 }
  0x52   : > { %v285_v59 = vmul.f32 0.5, %v284_v57 }
  0x53   : > { %v275_v60 = vmul.f32 0.5, %v274_v58 }
  0x54   : > { %v286_v61 = vsub.f32 1.5, %v285_v59 }
  0x55   : > { %v276_v62 = vsub.f32 1.5, %v275_v60 }
  0x56   : > { %v287_v63 = vmul.f32 %v452_v53, %v286_v61 }
  0x57   : > { %v277_v0 = vmul.f32 %v454_v55, %v276_v62 }
  0x58   : > { %v291_v1 = vsel %vm290_vm4, %v452_v53, %v287_v63 }
  0x59   : > { %v294_v2 = vrot.slane %v291_v1, 4  ;;  %v281_v3 = vsel %vm280_vm7, %v454_v55, %v277_v0 }
  0x5b   : > { %v295_v4 = vsel %vm217_vm0, %v281_v3, %v294_v2 }
  0x5c   : > { %v297_v5 = vmul.f32 %v295_v4, %v246_v31 }
  0x80   : > { %v302_v8 = vpop.permute.xlu0 %301 }
  0x81   : > { %v306_v10 = vperm.slane %v302_v8, %v305_v9 }
  0x83   : > { %v308_v12 = vmul.f32 %v306_v10, %v297_v5 }
  0x88   : > { %v313_v11 = vpop.permute.xlu0 %312 }
  0x89   : > { %v317_v13 = vperm.slane %v313_v11, %v305_v9 }
  0x8b   : > { %v319_v14 = vadd.f32 %v317_v13, %v308_v12 }
  0x8d   : > { %320 = vst [vmem:[%s208_s26] sm:$0xff] %v319_v14 }
  0x8e PF: > { %s13_s14 = sadd.s32 1, %s477_s14   ;;  %s558_s12 = smov %s473_s13 }
  0x8f   : > { %p10_p5 = scmp.ge.s32.totalorder %s13_s14, 4   ;;  %s559_s13 = smov %s561_s15 }
  0x91   :  { %12 = sbr.rel (!%p10_p5) target bundleno = 2 (0x2), region = 62 }

</bundles_post_ra>
